<compile_context>
chip_gen: v5e
topology: v5e:2x2
jax: 0.10.0
libtpu: 0.0.40
codegen_flags: <defaults>
</compile_context>

<pallas_src>
import functools

import jax
import jax.numpy as jnp
from jax.experimental import pallas as pl
from jax.experimental.pallas import tpu as pltpu

EPS = 1e-5  # PyTorch nn.LayerNorm default


def _vmem_limit_bytes():
    """Scoped VMEM budget: capacity - 16 MiB headroom, capped at 112 MiB."""
    try:
        cap = pltpu.get_tpu_info().vmem_capacity_bytes
    except Exception:
        cap = 64 * 1024 * 1024  # conservative (v7x-sized) fallback
    return int(min(cap - 16 * 1024 * 1024, 112 * 1024 * 1024))


VMEM_LIMIT = _vmem_limit_bytes()
_SMALL_VMEM = VMEM_LIMIT < 64 * 1024 * 1024      # 64-MiB parts (v7x)
ATTN_TQ_MAX = 128 if _SMALL_VMEM else 256        # query-row tile
LINEAR_ROWS_MAX = 512 if _SMALL_VMEM else 1024   # row tile for boundary linears


# ---------------------------------------------------------------------------
# In-kernel helpers
# ---------------------------------------------------------------------------
def _layernorm(x, g, b):
    # x: (R, D) f32; g, b: (1, D) f32
    mu = jnp.mean(x, axis=-1, keepdims=True)
    var = jnp.mean((x - mu) ** 2, axis=-1, keepdims=True)
    return (x - mu) * jax.lax.rsqrt(var + EPS) * g + b


def _gelu_exact(x):
    # PyTorch F.gelu default (erf-based)
    return 0.5 * x * (1.0 + jax.lax.erf(x * 0.7071067811865476))


def _row_tile(n, max_tile):
    """Largest row tile <= max_tile that divides n and is a multiple of 8."""
    if n <= max_tile:
        return n
    start = max_tile - (max_tile % 8)
    for t in range(start, 7, -8):
        if n % t == 0:
            return t
    # Fallback: no multiple-of-8 divisor <= max_tile; use the full extent
    # (valid block shape since it equals the array dim; keep n modest).
    return n


# ---------------------------------------------------------------------------
# Pallas kernels
# ---------------------------------------------------------------------------
def linear_kernel(x_ref, w_ref, b_ref, o_ref):
    # x_ref: (TR, Din) f32 ; w_ref: (Din, Dout) bf16 ; b_ref: (1, Dout) f32
    x = x_ref[...].astype(jnp.bfloat16)
    y = jnp.dot(x, w_ref[...], preferred_element_type=jnp.float32) + b_ref[...]
    o_ref[...] = y.astype(o_ref.dtype)


def block_kernel(x_ref, ln1g_ref, ln1b_ref, wqkv_ref, wo_ref,
                 ln2g_ref, ln2b_ref, w1_ref, b1_ref, w2_ref, b2_ref,
                 o_ref, q_s, k_s, v_s, *, heads, tq):
    # x_ref:    (1, T, D) f32  full sequence for this batch element (qi-invariant)
    # wqkv_ref: (D, 3D) bf16   [Wq | Wk | Wv]
    # wo_ref:   (D, D)  bf16
    # w1_ref:   (D, 2D) bf16   [value half | gate half] (GEGLU)
    # q_s/k_s/v_s: (H, T, hd) bf16 VMEM scratch, persistent across grid steps
    T, D = x_ref.shape[1], x_ref.shape[2]
    hd = D // heads
    scale = 1.0 / float(hd) ** 0.5
    qi = pl.program_id(1)

    # ---- one-time work per batch element: LN1 + fused lane-dense QKV matmul ----
    @pl.when(qi == 0)
    def _prologue():
        xf = x_ref[0].astype(jnp.float32)                                  # (T, D)
        xn = _layernorm(xf, ln1g_ref[...], ln1b_ref[...]).astype(jnp.bfloat16)
        qkv = jnp.dot(xn, wqkv_ref[...],
                      preferred_element_type=jnp.float32).astype(jnp.bfloat16)  # (T, 3D)
        # Head split once (static lane slices) into head-major bf16 scratch.
        for h in range(heads):
            q_s[h] = qkv[:, h * hd:(h + 1) * hd]
            k_s[h] = qkv[:, D + h * hd:D + (h + 1) * hd]
            v_s[h] = qkv[:, 2 * D + h * hd:2 * D + (h + 1) * hd]

    i0 = pl.multiple_of(qi * tq, tq)

    # ---- attention for this query-row tile (K/V reused from scratch) ----
    q = q_s[:, pl.ds(i0, tq), :]                                            # (H, tq, hd)
    s = jnp.einsum("hqf,hkf->hqk", q, k_s[...],
                   preferred_element_type=jnp.float32) * scale              # (H, tq, T)
    s = s - jnp.max(s, axis=-1, keepdims=True)
    p = jnp.exp(s)                                                          # f32 (v5e-safe)
    p = p * pl.reciprocal(jnp.sum(p, axis=-1, keepdims=True), approx=True)
    o = jnp.einsum("hqk,hkf->hqf", p.astype(jnp.bfloat16), v_s[...],
                   preferred_element_type=jnp.float32)                      # (H, tq, hd)

    # Output projection: concat heads on lanes -> one (tq, D) @ (D, D) matmul.
    o_cat = jnp.concatenate([o[h] for h in range(heads)],
                            axis=-1).astype(jnp.bfloat16)                   # (tq, D)
    attn = jnp.dot(o_cat, wo_ref[...], preferred_element_type=jnp.float32)  # (tq, D)

    x_rows = x_ref[0, pl.ds(i0, tq), :].astype(jnp.float32)                 # residual rows
    y = x_rows + attn

    # ---- fused feed-forward epilogue: LN2 + GEGLU + Linear + residual ----
    xn2 = _layernorm(y, ln2g_ref[...], ln2b_ref[...]).astype(jnp.bfloat16)
    h12 = jnp.dot(xn2, w1_ref[...], preferred_element_type=jnp.float32) + b1_ref[...]
    value, gate = h12[:, :D], h12[:, D:]                                    # GEGLU split
    ff = (_gelu_exact(gate) * value).astype(jnp.bfloat16)
    out = y + jnp.dot(ff, w2_ref[...], preferred_element_type=jnp.float32) + b2_ref[...]
    o_ref[0] = out.astype(o_ref.dtype)


# ---------------------------------------------------------------------------
# Pallas wrappers
# ---------------------------------------------------------------------------
def pallas_linear(x, w_bf16, b):
    B, S, Din = x.shape
    Dout = w_bf16.shape[1]
    R = B * S
    x2 = x.reshape(R, Din)
    tr = _row_tile(R, LINEAR_ROWS_MAX)
    nr = R // tr
    cost = pl.CostEstimate(
        flops=int(2 * R * Din * Dout), transcendentals=0,
        bytes_accessed=int(R * (Din + Dout) * 4 + Din * Dout * 2))
    y = pl.pallas_call(
        linear_kernel,
        out_shape=jax.ShapeDtypeStruct((R, Dout), x.dtype),
        grid=(nr,),
        in_specs=[
            pl.BlockSpec((tr, Din), lambda i: (i, 0)),
            pl.BlockSpec((Din, Dout), lambda i: (0, 0)),
            pl.BlockSpec((1, Dout), lambda i: (0, 0)),
        ],
        out_specs=pl.BlockSpec((tr, Dout), lambda i: (i, 0)),
        compiler_params=pltpu.CompilerParams(
            dimension_semantics=("parallel",), vmem_limit_bytes=VMEM_LIMIT),
        cost_estimate=cost,
    )(x2, w_bf16, b)
    return y.reshape(B, S, Dout)


def pallas_transformer_block(x, blk, heads):
    B, T, D = x.shape
    assert D % heads == 0
    hd = D // heads
    tq = _row_tile(T, ATTN_TQ_MAX)
    nq = T // tq
    kernel = functools.partial(block_kernel, heads=heads, tq=tq)
    cost = pl.CostEstimate(
        flops=int(B * T * D * (14 * D + 4 * T)),
        transcendentals=int(B * T * (heads * T + 4 * D)),
        bytes_accessed=int(2 * B * T * D * 4 + 14 * D * D))
    return pl.pallas_call(
        kernel,
        out_shape=jax.ShapeDtypeStruct((B, T, D), x.dtype),
        grid=(B, nq),
        in_specs=[
            pl.BlockSpec((1, T, D), lambda bi, qi: (bi, 0, 0)),   # full seq (qi-invariant)
            pl.BlockSpec((1, D), lambda bi, qi: (0, 0)),          # ln1 gamma
            pl.BlockSpec((1, D), lambda bi, qi: (0, 0)),          # ln1 beta
            pl.BlockSpec((D, 3 * D), lambda bi, qi: (0, 0)),      # Wqkv
            pl.BlockSpec((D, D), lambda bi, qi: (0, 0)),          # Wo
            pl.BlockSpec((1, D), lambda bi, qi: (0, 0)),          # ln2 gamma
            pl.BlockSpec((1, D), lambda bi, qi: (0, 0)),          # ln2 beta
            pl.BlockSpec((D, 2 * D), lambda bi, qi: (0, 0)),      # W1 (GEGLU)
            pl.BlockSpec((1, 2 * D), lambda bi, qi: (0, 0)),      # b1
            pl.BlockSpec((D, D), lambda bi, qi: (0, 0)),          # W2
            pl.BlockSpec((1, D), lambda bi, qi: (0, 0)),          # b2
        ],
        out_specs=pl.BlockSpec((1, tq, D), lambda bi, qi: (bi, qi, 0)),
        scratch_shapes=[
            pltpu.VMEM((heads, T, hd), jnp.bfloat16),             # Q
            pltpu.VMEM((heads, T, hd), jnp.bfloat16),             # K
            pltpu.VMEM((heads, T, hd), jnp.bfloat16),             # V
        ],
        compiler_params=pltpu.CompilerParams(
            dimension_semantics=("parallel", "arbitrary"),
            vmem_limit_bytes=VMEM_LIMIT),
        cost_estimate=cost,
    )(x, blk["ln1g"], blk["ln1b"], blk["wqkv"], blk["wo"],
      blk["ln2g"], blk["ln2b"], blk["w1"], blk["b1"], blk["w2"], blk["b2"])


# ---------------------------------------------------------------------------
# Parameters: init (f32, PyTorch-like) + one-time packing for the kernels
# ---------------------------------------------------------------------------
def init_params(key, input_dim, output_dim, inner_dim, depth, memory_tokens):
    ks = jax.random.split(key, 4 + depth)
    D = inner_dim
    scale = 0.02

    def nrm(k, shape):
        return scale * jax.random.normal(k, shape, dtype=jnp.float32)

    blocks = []
    for d in range(depth):
        bk = jax.random.split(ks[4 + d], 4)
        blocks.append((
            jnp.ones((1, D), jnp.float32),            # ln1 gamma
            jnp.zeros((1, D), jnp.float32),           # ln1 beta
            nrm(bk[0], (3, D, D)),                    # Wq, Wk, Wv (attn_bias=False)
            nrm(bk[1], (D, D)),                       # Wo
            jnp.ones((1, D), jnp.float32),            # ln2 gamma
            jnp.zeros((1, D), jnp.float32),           # ln2 beta
            nrm(bk[2], (2, D, D)),                    # ff W1: [value half, gate half]
            jnp.zeros((2, 1, D), jnp.float32),        # ff b1
            nrm(bk[3], (D, D)),                       # ff W2
            jnp.zeros((1, D), jnp.float32),           # ff b2
        ))
    has_in = input_dim != D
    has_out = output_dim != D
    return {
        "in_w": nrm(ks[0], (input_dim, D)) if has_in else None,
        "in_b": jnp.zeros((1, D), jnp.float32) if has_in else None,
        "out_w": nrm(ks[1], (D, output_dim)) if has_out else None,
        "out_b": jnp.zeros((1, output_dim), jnp.float32) if has_out else None,
        "memory": jax.random.normal(ks[2], (memory_tokens, D), jnp.float32),
        "blocks": blocks,
    }


def prepare_params(params):
    """One-time weight packing (bf16 cast + concat) — hoisted out of forward()."""
    packed_blocks = []
    for blk in params["blocks"]:
        (ln1g, ln1b, wqkv, wo, ln2g, ln2b, w1, b1, w2, b2) = blk
        packed_blocks.append({
            "ln1g": ln1g, "ln1b": ln1b,
            "wqkv": jnp.concatenate([wqkv[0], wqkv[1], wqkv[2]], axis=1).astype(jnp.bfloat16),
            "wo": wo.astype(jnp.bfloat16),
            "ln2g": ln2g, "ln2b": ln2b,
            "w1": jnp.concatenate([w1[0], w1[1]], axis=1).astype(jnp.bfloat16),
            "b1": jnp.concatenate([b1[0], b1[1]], axis=1),
            "w2": w2.astype(jnp.bfloat16),
            "b2": b2,
        })
    return {
        "in_w": None if params["in_w"] is None else params["in_w"].astype(jnp.bfloat16),
        "in_b": params["in_b"],
        "out_w": None if params["out_w"] is None else params["out_w"].astype(jnp.bfloat16),
        "out_b": params["out_b"],
        "memory": params["memory"],
        "blocks": packed_blocks,
    }


def forward(x, packed, heads):
    if packed["in_w"] is not None:
        x = pallas_linear(x, packed["in_w"], packed["in_b"])       # embed projection
    B = x.shape[0]
    mem = jnp.broadcast_to(packed["memory"][None], (B,) + packed["memory"].shape)
    x = jnp.concatenate([x, mem], axis=1)                          # append memory tokens
    # NOTE: for real configs keep (S + memory_tokens) a multiple of 8 and
    # inner_dim a multiple of 128 (ideally head_dim in {128, 256}) for alignment.
    for blk in packed["blocks"]:
        x = pallas_transformer_block(x, blk, heads)
    M = packed["memory"].shape[0]
    if M > 0:
        x = x[:, :-M]                                              # drop memory tokens
    if packed["out_w"] is not None:
        x = pallas_linear(x, packed["out_w"], packed["out_b"])     # decoding projection
    return x


# ---------------------------------------------------------------------------
# Pure-JAX reference (f32) for correctness check
# ---------------------------------------------------------------------------
def _ref_block(x, blk, heads):
    (ln1g, ln1b, wqkv, wo, ln2g, ln2b, w1, b1, w2, b2) = blk
    B, T, D = x.shape
    hd = D // heads

    def ln(v, g, b):
        mu = jnp.mean(v, -1, keepdims=True)
        var = jnp.mean((v - mu) ** 2, -1, keepdims=True)
        return (v - mu) * jax.lax.rsqrt(var + EPS) * g + b

    xn = ln(x, ln1g, ln1b)
    q = (xn @ wqkv[0]).reshape(B, T, heads, hd)
    k = (xn @ wqkv[1]).reshape(B, T, heads, hd)
    v = (xn @ wqkv[2]).reshape(B, T, heads, hd)
    s = jnp.einsum("bthd,bshd->bhts", q, k) / (hd ** 0.5)
    p = jax.nn.softmax(s, axis=-1)
    o = jnp.einsum("bhts,bshd->bthd", p, v).reshape(B, T, D)
    x = x + o @ wo

    xn2 = ln(x, ln2g, ln2b)
    a = xn2 @ w1[0] + b1[0]
    gate = xn2 @ w1[1] + b1[1]
    ff = _gelu_exact(gate) * a
    return x + (ff @ w2 + b2)


def forward_ref(x, params, heads):
    if params["in_w"] is not None:
        x = x @ params["in_w"] + params["in_b"]
    B = x.shape[0]
    mem = jnp.broadcast_to(params["memory"][None], (B,) + params["memory"].shape)
    x = jnp.concatenate([x, mem], axis=1)
    for blk in params["blocks"]:
        x = _ref_block(x, blk, heads)
    M = params["memory"].shape[0]
    if M > 0:
        x = x[:, :-M]
    if params["out_w"] is not None:
        x = x @ params["out_w"] + params["out_b"]
    return x


# ---------------------------------------------------------------------------
if __name__ == "__main__":
    B, S = 2, 8
    INPUT_DIM, OUTPUT_DIM = 16, 16
    INNER_DIM, HEADS, DEPTH, MEM = 32, 4, 2, 8

    key = jax.random.PRNGKey(0)
    kx, kp = jax.random.split(key)
    x = jax.random.normal(kx, (B, S, INPUT_DIM), dtype=jnp.float32)
    params = init_params(kp, INPUT_DIM, OUTPUT_DIM, INNER_DIM, DEPTH, MEM)
    packed = prepare_params(params)   # one-time weight packing (hoisted)

    out = jax.block_until_ready(forward(x, packed, heads=HEADS))
    ref = forward_ref(x, params, heads=HEADS)

    assert out.shape == (B, S, OUTPUT_DIM), out.shape
    err = float(jnp.max(jnp.abs(out - ref)))
    assert jnp.allclose(out, ref, atol=3e-2, rtol=3e-2), err

    print("KERNEL_OK")
</pallas_src>

<mosaic_0001>
module attributes {stable_mosaic.version = 11 : i64} {
  func.func @linear_kernel(%arg0: i32, %arg1: memref<16x16xf32, #tpu.memory_space<vmem>>, %arg2: memref<16x32xbf16, #tpu.memory_space<vmem>>, %arg3: memref<1x32xf32, #tpu.memory_space<vmem>>, %arg4: memref<16x32xf32, #tpu.memory_space<vmem>>) attributes {dimension_semantics = [#tpu.dimension_semantics<parallel>], iteration_bounds = array<i64: 1>, scalar_prefetch = 0 : i64, scratch_operands = 0 : i64, tpu.core_type = #tpu.core_type<tc>, window_params = [{transform_indices = @transform_0, window_bounds = array<i64: 16, 16>}, {pipeline_mode = #tpu.pipeline_mode<synchronous>, transform_indices = @transform_1, window_bounds = array<i64: 16, 32>}, {pipeline_mode = #tpu.pipeline_mode<synchronous>, transform_indices = @transform_2, window_bounds = array<i64: 1, 32>}, {transform_indices = @transform_3, window_bounds = array<i64: 16, 32>}]} {
    %c0 = arith.constant 0 : index
    %c0_0 = arith.constant 0 : index
    %0 = vector.load %arg1[%c0, %c0_0] : memref<16x16xf32, #tpu.memory_space<vmem>>, vector<16x16xf32>
    %1 = arith.truncf %0 : vector<16x16xf32> to vector<16x16xbf16>
    %c0_1 = arith.constant 0 : index
    %c0_2 = arith.constant 0 : index
    %2 = vector.load %arg2[%c0_1, %c0_2] : memref<16x32xbf16, #tpu.memory_space<vmem>>, vector<16x32xbf16>
    %cst = arith.constant dense<0.000000e+00> : vector<16x32xf32>
    %3 = tpu.matmul %1, %2, %cst {dimension_numbers = #tpu.dot_dimension_numbers<[1], [0], [0], [1], [0, 0, 1, 1], [], []>} : vector<16x16xbf16>, vector<16x32xbf16>, vector<16x32xf32> -> vector<16x32xf32>
    %c0_3 = arith.constant 0 : index
    %c0_4 = arith.constant 0 : index
    %4 = vector.load %arg3[%c0_3, %c0_4] : memref<1x32xf32, #tpu.memory_space<vmem>>, vector<1x32xf32>
    %5 = vector.broadcast %4 : vector<1x32xf32> to vector<16x32xf32>
    %6 = arith.addf %3, %5 : vector<16x32xf32>
    %c0_5 = arith.constant 0 : index
    %c0_6 = arith.constant 0 : index
    %7 = vector.load %arg4[%c0_5, %c0_6] : memref<16x32xf32, #tpu.memory_space<vmem>>, vector<16x32xf32>
    tpu.vector_store %arg4[%c0_5, %c0_6], %6 {strides = array<i32>} : memref<16x32xf32, #tpu.memory_space<vmem>>, vector<16x32xf32>,
    return
  }
  func.func @transform_0(%arg0: i32) -> (i32, i32) {
    %c0_i32 = arith.constant 0 : i32
    %c0_i32_0 = arith.constant 0 : i32
    return %arg0, %c0_i32 : i32, i32
  }
  func.func @transform_1(%arg0: i32) -> (i32, i32) {
    %c0_i32 = arith.constant 0 : i32
    %c0_i32_0 = arith.constant 0 : i32
    %c0_i32_1 = arith.constant 0 : i32
    return %c0_i32, %c0_i32_0 : i32, i32
  }
  func.func @transform_2(%arg0: i32) -> (i32, i32) {
    %c0_i32 = arith.constant 0 : i32
    %c0_i32_0 = arith.constant 0 : i32
    %c0_i32_1 = arith.constant 0 : i32
    return %c0_i32, %c0_i32_0 : i32, i32
  }
  func.func @transform_3(%arg0: i32) -> (i32, i32) {
    %c0_i32 = arith.constant 0 : i32
    %c0_i32_0 = arith.constant 0 : i32
    return %arg0, %c0_i32 : i32, i32
  }
}

</mosaic_0001>

<bundles_post_ra>
// kernel: tpu_custom_call.1
= control target key start
LH: loop header
LB: loop body
LE: loop exit
PB: predicated region body
PF: predicated region fallthrough
CT: control target
= control target key end

     0   :  { %8 = vsyncpa [#allocation3], 0  ;;  %s241_s0 = inlined_call_operand.hbm [shape: f32[16,16], index: 0, kind: input, shape index: {}]   ;;  %s242_s1 = inlined_call_operand.hbm [shape: bf16[16,32], index: 1, kind: input, shape index: {}]   ;;  %s243_s2 = inlined_call_operand.vmem [shape: f32[1,32], index: 2, kind: input, shape index: {}]   ;;  %s244_s3 = inlined_call_operand.hbm [shape: f32[16,32], index: 3, kind: output, shape index: {}]  }
   0x1   :  { %9 = vsyncpa [#allocation6], 0 }
   0x2   :  { %10 = vsyncpa [#allocation4], 0  ;;  %s15_s14 = sshll.u32 %s241_s0, 4  ;;  %s196_s15 = smov [#allocation2]   ;;  %s16_s14 = int_to_ptr.hbm [resolvable:$true] %s15_s14 }
   0x3   :  { %s17_s16 = sshll.u32 %s196_s15, 4  ;;  %s28_s19 = sshll.u32 %s242_s1, 4  ;;  %s18_s16 = int_to_ptr.vmem [resolvable:$true] %s17_s16  ;;  %s29_s19 = int_to_ptr.hbm [resolvable:$true] %s28_s19 }
   0x4   :  { %s197_s20 = smov 128   ;;  %s198_s21 = smov 8  }
   0x5   :  { %23 = dma.hbm_to_vmem [thread:$0]  %s16_s14, 256, %s18_s16, [#allocation3], %s197_s20, %s197_s20, %s198_s21  }
   0x6   :  { %s199_s22 = smov [#allocation5]   ;;  %s200_s24 = smov 64  }
   0x7   :  { %s30_s23 = sshll.u32 %s199_s22, 4  ;;  %s201_s0 = smov 4   ;;  %s31_s23 = int_to_ptr.vmem [resolvable:$true] %s30_s23 }
   0x8   :  { %36 = dma.hbm_to_vmem [thread:$0]  %s29_s19, 128, %s31_s23, [#allocation6], %s200_s24, %s200_s24, %s201_s0  }
   0x9   :  { %190 = dma.done.wait [#allocation3], 256  }
   0xa   :  { %191 = vsyncadd [#allocation3], 4294967040 }
   0xb   :  { %192 = dma.done.wait [#allocation6], 128  }
   0xc   :  { %193 = vsyncadd [#allocation6], 4294967168  ;;  %v109_v0 = vld [vmem:[#allocation5] sm:$0xff]  ;;  %v48_v1 = vld [vmem:[#allocation2] sm:$0xff]  ;;  %vm63_vm0 = vcmask 130048   ;;  %vm81_vm1 = vcmask 261120  }
   0xd   :  { %v49_v2 = vld [vmem:[#allocation2 + $0x8] sm:$0xff]  ;;  %74 = vmatpush.bf16.msra.mxu0 %v109_v0  ;;  %v117_v4 = vld [vmem:[%s243_s2] ss:$0 sm:$0xff]  ;;  %s202_s26 = smov [#allocation7]   ;;  %s90_s30 = sshll.u32 %s244_s3, 4  ;;  %s91_s30 = int_to_ptr.hbm [resolvable:$true] %s90_s30 }
   0xe   :  { %v50_v3 = vpack.c.bf16 %v49_v2, %v48_v1  ;;  %s88_s27 = sshll.u32 %s202_s26, 4  ;;  %s89_s27 = int_to_ptr.vmem [resolvable:$true] %s88_s27 }
  0x10   :  { %108 = vmatmul.msk.bf16.vlgmr.msra.gmra.mxu0 %vm63_vm0, %v50_v3 }
  0x8d   :  { %v76_v5 = vpop.f32.mrf.mxu0 }
  0x8e   :  { %v77_v6 = vadd.f32 %v117_v4, %v76_v5 }
  0x90   :  { %82 = vst.msk [vmem:[#allocation7] sm:$0xff] %vm81_vm1, %v77_v6 }
  0x95   :  { %v78_v7 = vpop.f32.mrf.mxu0 }
  0x96   :  { %v79_v8 = vadd.f32 %v117_v4, %v78_v7 }
  0x98   :  { %83 = vst.msk [vmem:[#allocation7 + $0x8] sm:$0xff] %vm81_vm1, %v79_v8 }
  0x99   :  { %96 = dma.vmem_to_hbm [thread:$0]  %s89_s27, 256, %s91_s30, [#allocation4], %s197_s20, %s197_s20, %s198_s21  }
  0x9a   :  { %194 = dma.done.wait [#allocation4], 256  }
  0x9b   :  { %195 = vsyncadd [#allocation4], 4294967040 }
  0x9c   :  { %101 = vsyncpa [#allocation3], 1 }
  0x9d   :  { %102 = vsyncpa [#allocation6], 1 }
  0x9e   :  { %103 = vsyncpa [#allocation4], 1 }

</bundles_post_ra>
